<compile_context>
chip_gen: v7x
topology: tpu7x:2x2x1
jax: 0.10.0
libtpu: 0.0.40
codegen_flags: <defaults>
</compile_context>

<pallas_src>
from functools import partial

import jax
import jax.numpy as jnp
from jax.experimental import pallas as pl
from jax.experimental.pallas import tpu as pltpu


def lstm_predictor_kernel(x_ref, wih_ref, whh_ref, misc_ref, out_ref, *,
                          hidden_size, batch_pad, hist_len, future_len,
                          mxu_dtype):
    """Whole forward pass in one kernel invocation (no grid).

    x_ref    : (T*Bp, I)   time-major flattened history, batch padded to Bp
    wih_ref  : (I, 4H)     input->gates weights (pre-transposed), f32
    whh_ref  : (H, 4H)     hidden->gates weights (pre-transposed), mxu_dtype
    misc_ref : (8, 4H)     fused small params:
                             row 0        = b_ih + b_hh        (4H lanes)
                             row 1[:H]    = fc weight           (H lanes)
                             row 2[0]     = fc bias             (1 lane)
    out_ref  : (Bp, future_len)  predictions (lane-dense single tile)
    """
    H, Bp, T, F = hidden_size, batch_pad, hist_len, future_len

    # Hoist loop-invariant Ref loads; these stay resident across all steps.
    wih = wih_ref[...]                    # (I, 4H) f32
    whh = whh_ref[...]                    # (H, 4H) bf16 or f32 (MXU operand)
    misc = misc_ref[...]                  # (8, 4H) f32
    b = misc[0:1, :]                      # (1, 4H) combined LSTM bias
    fcw_row = misc[1:2, 0:H]              # (1, H)  fc weight row
    fcb = misc[2:3, 0:1]                  # (1, 1)  fc bias

    # Input projection for ALL history steps in one MXU call:
    #   (T*Bp, I) @ (I, 4H) + b  -> (T*Bp, 4H), rows ordered time-major and
    #   8-sublane aligned per step (Bp is a multiple of 8).
    gates_x = jnp.dot(x_ref[...], wih, preferred_element_type=jnp.float32) + b

    def recur(gx, h, c):
        # Only the recurrent projection sits on the serial chain; its operands
        # go through the MXU in bf16 (one pass instead of ~3 f32 passes) while
        # the accumulation and all elementwise math stay f32 (v5e-safe).
        h_mxu = h.astype(mxu_dtype)
        gates = gx + jnp.dot(h_mxu, whh, preferred_element_type=jnp.float32)
        # Two full-width EUP passes, then static lane slices. Gate order: i,f,g,o.
        sg = jax.nn.sigmoid(gates)
        th = jnp.tanh(gates)
        i_g = sg[:, 0:H]
        f_g = sg[:, H:2 * H]
        g_g = th[:, 2 * H:3 * H]
        o_g = sg[:, 3 * H:4 * H]
        c_new = f_g * c + i_g * g_g
        h_new = o_g * jnp.tanh(c_new)
        return h_new, c_new

    h = jnp.zeros((Bp, H), jnp.float32)
    c = jnp.zeros((Bp, H), jnp.float32)

    # --- history: fully unrolled (T static), vreg-aligned static slices ---
    for t in range(T):
        h, c = recur(gates_x[t * Bp:(t + 1) * Bp, :], h, c)

    # --- decode: input frozen to the last history step -> its precomputed
    #     gate projection is reused; no input matmul in this loop at all ---
    gx_last = gates_x[(T - 1) * Bp:T * Bp, :]        # (Bp, 4H)
    cols = []
    for _ in range(F):                               # F static -> unrolled
        h, c = recur(gx_last, h, c)
        # fc head: VPU mul + XLU lane-reduce, off the recurrence chain
        # (no N=1 MXU matmul).
        cols.append(jnp.sum(h * fcw_row, axis=-1, keepdims=True))   # (Bp, 1)

    # Single lane-dense tile store: (Bp, F) in one vreg region.
    preds = jnp.concatenate(cols, axis=1) + fcb      # (Bp, F)
    out_ref[...] = preds.astype(out_ref.dtype)


def lstm_days_predictor(x_hist, params, future_len, *, use_bf16_matmul=True):
    """Wrapper: parameter plumbing + pallas_call. x_hist: (B, T, I) float32."""
    B, T, I = x_hist.shape
    H = params["hidden_size"]
    G = 4 * H

    # Pad batch to the f32 sublane count so per-step slices of the projected
    # gates are (8,128)-aligned vreg blocks; padded rows are independent and
    # dropped from the output below.
    Bp = ((B + 7) // 8) * 8

    # Time-major flatten so each step's projected-gate rows form a contiguous,
    # aligned (Bp, 4H) block: row index = t*Bp + b.
    x_tm = jnp.transpose(x_hist, (1, 0, 2)).astype(jnp.float32)     # (T, B, I)
    x_tm = jnp.pad(x_tm, ((0, 0), (0, Bp - B), (0, 0)))             # (T, Bp, I)
    x_flat = x_tm.reshape(T * Bp, I)

    mxu_dtype = jnp.bfloat16 if use_bf16_matmul else jnp.float32
    wih = params["w_ih"].T.astype(jnp.float32)                      # (I, 4H)
    whh = params["w_hh"].T.astype(mxu_dtype)                        # (H, 4H)

    # Fuse the three tiny parameters into one padded (8, 4H) slab -> one DMA.
    misc = jnp.zeros((8, G), jnp.float32)
    misc = misc.at[0, :].set((params["b_ih"] + params["b_hh"]).astype(jnp.float32))
    misc = misc.at[1, :H].set(params["fc_w"].reshape(H).astype(jnp.float32))
    misc = misc.at[2, 0].set(params["fc_b"].reshape(()).astype(jnp.float32))

    kernel = partial(lstm_predictor_kernel, hidden_size=H, batch_pad=Bp,
                     hist_len=T, future_len=future_len, mxu_dtype=mxu_dtype)

    vmem = pl.BlockSpec(memory_space=pltpu.MemorySpace.VMEM)
    preds = pl.pallas_call(
        kernel,
        out_shape=jax.ShapeDtypeStruct((Bp, future_len), jnp.float32),
        in_specs=[vmem] * 4,
        out_specs=vmem,
    )(x_flat, wih, whh, misc)

    # Drop padded batch rows: (Bp, F) -> (B, F).  No transpose needed.
    return preds[:B, :]


def _reference_forward(x_hist, params, future_len):
    """Pure-JAX reference (mirrors PyTorch nn.LSTM + nn.Linear), all f32."""
    H = params["hidden_size"]
    w_ih, w_hh = params["w_ih"], params["w_hh"]
    b = params["b_ih"] + params["b_hh"]

    def step(x_t, h, c):
        gates = x_t @ w_ih.T + h @ w_hh.T + b
        i = jax.nn.sigmoid(gates[:, 0:H])
        f = jax.nn.sigmoid(gates[:, H:2 * H])
        g = jnp.tanh(gates[:, 2 * H:3 * H])
        o = jax.nn.sigmoid(gates[:, 3 * H:4 * H])
        c = f * c + i * g
        h = o * jnp.tanh(c)
        return h, c

    B, T, _ = x_hist.shape
    h = jnp.zeros((B, H), jnp.float32)
    c = jnp.zeros((B, H), jnp.float32)
    for t in range(T):
        h, c = step(x_hist[:, t, :], h, c)
    x_last = x_hist[:, -1, :]
    preds = []
    for _ in range(future_len):
        h, c = step(x_last, h, c)
        preds.append(h @ params["fc_w"].T + params["fc_b"])   # (B, 1)
    return jnp.concatenate(preds, axis=1)                     # (B, future_len)


if __name__ == "__main__":
    B, T, I, H, FUTURE_LEN = 2, 8, 4, 32, 5

    key = jax.random.PRNGKey(0)
    keys = jax.random.split(key, 7)
    bound = 1.0 / float(H) ** 0.5
    params = {
        "hidden_size": H,
        # nn.LSTM parameter shapes: weight_ih (4H, I), weight_hh (4H, H),
        # bias_ih (4H,), bias_hh (4H,); nn.Linear: weight (1, H), bias (1,)
        "w_ih": jax.random.uniform(keys[0], (4 * H, I), jnp.float32, -bound, bound),
        "w_hh": jax.random.uniform(keys[1], (4 * H, H), jnp.float32, -bound, bound),
        "b_ih": jax.random.uniform(keys[2], (4 * H,), jnp.float32, -bound, bound),
        "b_hh": jax.random.uniform(keys[3], (4 * H,), jnp.float32, -bound, bound),
        "fc_w": jax.random.uniform(keys[4], (1, H), jnp.float32, -bound, bound),
        "fc_b": jax.random.uniform(keys[5], (1,), jnp.float32, -bound, bound),
    }
    x_hist = jax.random.normal(keys[6], (B, T, I), jnp.float32)

    ref = _reference_forward(x_hist, params, FUTURE_LEN)

    # Exact-f32 MXU path: tight tolerance against the reference.
    out_f32 = lstm_days_predictor(x_hist, params, FUTURE_LEN, use_bf16_matmul=False)
    out_f32 = jax.block_until_ready(out_f32)
    assert out_f32.shape == (B, FUTURE_LEN), out_f32.shape
    assert jnp.allclose(out_f32, ref, rtol=1e-5, atol=1e-5), (out_f32, ref)

    # Default fast path (bf16 recurrent-matmul operands): relaxed tolerance.
    out = lstm_days_predictor(x_hist, params, FUTURE_LEN)
    out = jax.block_until_ready(out)
    assert out.shape == (B, FUTURE_LEN), out.shape
    assert jnp.allclose(out, ref, rtol=5e-2, atol=5e-2), (out, ref)

    print("KERNEL_OK")
</pallas_src>

<mosaic_0001>
module attributes {stable_mosaic.version = 11 : i64} {
  func.func @lstm_predictor_kernel(%arg0: memref<64x4xf32, #tpu.memory_space<vmem>>, %arg1: memref<4x128xf32, #tpu.memory_space<vmem>>, %arg2: memref<32x128xf32, #tpu.memory_space<vmem>>, %arg3: memref<8x128xf32, #tpu.memory_space<vmem>>, %arg4: memref<8x5xf32, #tpu.memory_space<vmem>>) attributes {dimension_semantics = [], scalar_prefetch = 0 : i64, scratch_operands = 0 : i64, tpu.core_type = #tpu.core_type<tc>} {
    %c0 = arith.constant 0 : index
    %c0_0 = arith.constant 0 : index
    %0 = vector.load %arg1[%c0, %c0_0] : memref<4x128xf32, #tpu.memory_space<vmem>>, vector<4x128xf32>
    %c0_1 = arith.constant 0 : index
    %c0_2 = arith.constant 0 : index
    %1 = vector.load %arg2[%c0_1, %c0_2] : memref<32x128xf32, #tpu.memory_space<vmem>>, vector<32x128xf32>
    %c0_3 = arith.constant 0 : index
    %c0_4 = arith.constant 0 : index
    %2 = vector.load %arg3[%c0_3, %c0_4] : memref<8x128xf32, #tpu.memory_space<vmem>>, vector<8x128xf32>
    %3 = vector.extract_strided_slice %2 {offsets = [0, 0], sizes = [1, 128], strides = [1, 1]} : vector<8x128xf32> to vector<1x128xf32>
    %4 = vector.extract_strided_slice %2 {offsets = [1, 0], sizes = [1, 32], strides = [1, 1]} : vector<8x128xf32> to vector<1x32xf32>
    %5 = vector.extract_strided_slice %2 {offsets = [2, 0], sizes = [1, 1], strides = [1, 1]} : vector<8x128xf32> to vector<1x1xf32>
    %c0_5 = arith.constant 0 : index
    %c0_6 = arith.constant 0 : index
    %6 = vector.load %arg0[%c0_5, %c0_6] : memref<64x4xf32, #tpu.memory_space<vmem>>, vector<64x4xf32>
    %cst = arith.constant dense<0.000000e+00> : vector<64x128xf32>
    %7 = tpu.matmul %6, %0, %cst {dimension_numbers = #tpu.dot_dimension_numbers<[1], [0], [0], [1], [0, 0, 1, 1], [], []>} : vector<64x4xf32>, vector<4x128xf32>, vector<64x128xf32> -> vector<64x128xf32>
    %8 = vector.broadcast %3 : vector<1x128xf32> to vector<64x128xf32>
    %9 = arith.addf %7, %8 : vector<64x128xf32>
    %cst_7 = arith.constant 0.000000e+00 : f32
    %10 = vector.broadcast %cst_7 : f32 to vector<8x32xf32>
    %cst_8 = arith.constant 0.000000e+00 : f32
    %11 = vector.broadcast %cst_8 : f32 to vector<8x32xf32>
    %12 = vector.extract_strided_slice %9 {offsets = [0, 0], sizes = [8, 128], strides = [1, 1]} : vector<64x128xf32> to vector<8x128xf32>
    %cst_9 = arith.constant dense<0.000000e+00> : vector<8x128xf32>
    %13 = tpu.matmul %10, %1, %cst_9 {dimension_numbers = #tpu.dot_dimension_numbers<[1], [0], [0], [1], [0, 0, 1, 1], [], []>} : vector<8x32xf32>, vector<32x128xf32>, vector<8x128xf32> -> vector<8x128xf32>
    %14 = arith.addf %12, %13 : vector<8x128xf32>
    %15 = arith.negf %14 : vector<8x128xf32>
    %16 = math.exp %15 : vector<8x128xf32>
    %cst_10 = arith.constant 1.000000e+00 : f32
    %17 = vector.broadcast %cst_10 : f32 to vector<8x128xf32>
    %18 = arith.addf %17, %16 : vector<8x128xf32>
    %19 = arith.divf %17, %18 : vector<8x128xf32>
    %20 = math.tanh %14 : vector<8x128xf32>
    %21 = vector.extract_strided_slice %19 {offsets = [0, 0], sizes = [8, 32], strides = [1, 1]} : vector<8x128xf32> to vector<8x32xf32>
    %22 = vector.extract_strided_slice %19 {offsets = [0, 32], sizes = [8, 32], strides = [1, 1]} : vector<8x128xf32> to vector<8x32xf32>
    %23 = vector.extract_strided_slice %20 {offsets = [0, 64], sizes = [8, 32], strides = [1, 1]} : vector<8x128xf32> to vector<8x32xf32>
    %24 = vector.extract_strided_slice %19 {offsets = [0, 96], sizes = [8, 32], strides = [1, 1]} : vector<8x128xf32> to vector<8x32xf32>
    %25 = arith.mulf %22, %11 : vector<8x32xf32>
    %26 = arith.mulf %21, %23 : vector<8x32xf32>
    %27 = arith.addf %25, %26 : vector<8x32xf32>
    %28 = math.tanh %27 : vector<8x32xf32>
    %29 = arith.mulf %24, %28 : vector<8x32xf32>
    %30 = vector.extract_strided_slice %9 {offsets = [8, 0], sizes = [8, 128], strides = [1, 1]} : vector<64x128xf32> to vector<8x128xf32>
    %cst_11 = arith.constant dense<0.000000e+00> : vector<8x128xf32>
    %31 = tpu.matmul %29, %1, %cst_11 {dimension_numbers = #tpu.dot_dimension_numbers<[1], [0], [0], [1], [0, 0, 1, 1], [], []>} : vector<8x32xf32>, vector<32x128xf32>, vector<8x128xf32> -> vector<8x128xf32>
    %32 = arith.addf %30, %31 : vector<8x128xf32>
    %33 = arith.negf %32 : vector<8x128xf32>
    %34 = math.exp %33 : vector<8x128xf32>
    %cst_12 = arith.constant 1.000000e+00 : f32
    %35 = vector.broadcast %cst_12 : f32 to vector<8x128xf32>
    %36 = arith.addf %35, %34 : vector<8x128xf32>
    %37 = arith.divf %35, %36 : vector<8x128xf32>
    %38 = math.tanh %32 : vector<8x128xf32>
    %39 = vector.extract_strided_slice %37 {offsets = [0, 0], sizes = [8, 32], strides = [1, 1]} : vector<8x128xf32> to vector<8x32xf32>
    %40 = vector.extract_strided_slice %37 {offsets = [0, 32], sizes = [8, 32], strides = [1, 1]} : vector<8x128xf32> to vector<8x32xf32>
    %41 = vector.extract_strided_slice %38 {offsets = [0, 64], sizes = [8, 32], strides = [1, 1]} : vector<8x128xf32> to vector<8x32xf32>
    %42 = vector.extract_strided_slice %37 {offsets = [0, 96], sizes = [8, 32], strides = [1, 1]} : vector<8x128xf32> to vector<8x32xf32>
    %43 = arith.mulf %40, %27 : vector<8x32xf32>
    %44 = arith.mulf %39, %41 : vector<8x32xf32>
    %45 = arith.addf %43, %44 : vector<8x32xf32>
    %46 = math.tanh %45 : vector<8x32xf32>
    %47 = arith.mulf %42, %46 : vector<8x32xf32>
    %48 = vector.extract_strided_slice %9 {offsets = [16, 0], sizes = [8, 128], strides = [1, 1]} : vector<64x128xf32> to vector<8x128xf32>
    %cst_13 = arith.constant dense<0.000000e+00> : vector<8x128xf32>
    %49 = tpu.matmul %47, %1, %cst_13 {dimension_numbers = #tpu.dot_dimension_numbers<[1], [0], [0], [1], [0, 0, 1, 1], [], []>} : vector<8x32xf32>, vector<32x128xf32>, vector<8x128xf32> -> vector<8x128xf32>
    %50 = arith.addf %48, %49 : vector<8x128xf32>
    %51 = arith.negf %50 : vector<8x128xf32>
    %52 = math.exp %51 : vector<8x128xf32>
    %cst_14 = arith.constant 1.000000e+00 : f32
    %53 = vector.broadcast %cst_14 : f32 to vector<8x128xf32>
    %54 = arith.addf %53, %52 : vector<8x128xf32>
    %55 = arith.divf %53, %54 : vector<8x128xf32>
    %56 = math.tanh %50 : vector<8x128xf32>
    %57 = vector.extract_strided_slice %55 {offsets = [0, 0], sizes = [8, 32], strides = [1, 1]} : vector<8x128xf32> to vector<8x32xf32>
    %58 = vector.extract_strided_slice %55 {offsets = [0, 32], sizes = [8, 32], strides = [1, 1]} : vector<8x128xf32> to vector<8x32xf32>
    %59 = vector.extract_strided_slice %56 {offsets = [0, 64], sizes = [8, 32], strides = [1, 1]} : vector<8x128xf32> to vector<8x32xf32>
    %60 = vector.extract_strided_slice %55 {offsets = [0, 96], sizes = [8, 32], strides = [1, 1]} : vector<8x128xf32> to vector<8x32xf32>
    %61 = arith.mulf %58, %45 : vector<8x32xf32>
    %62 = arith.mulf %57, %59 : vector<8x32xf32>
    %63 = arith.addf %61, %62 : vector<8x32xf32>
    %64 = math.tanh %63 : vector<8x32xf32>
    %65 = arith.mulf %60, %64 : vector<8x32xf32>
    %66 = vector.extract_strided_slice %9 {offsets = [24, 0], sizes = [8, 128], strides = [1, 1]} : vector<64x128xf32> to vector<8x128xf32>
    %cst_15 = arith.constant dense<0.000000e+00> : vector<8x128xf32>
    %67 = tpu.matmul %65, %1, %cst_15 {dimension_numbers = #tpu.dot_dimension_numbers<[1], [0], [0], [1], [0, 0, 1, 1], [], []>} : vector<8x32xf32>, vector<32x128xf32>, vector<8x128xf32> -> vector<8x128xf32>
    %68 = arith.addf %66, %67 : vector<8x128xf32>
    %69 = arith.negf %68 : vector<8x128xf32>
    %70 = math.exp %69 : vector<8x128xf32>
    %cst_16 = arith.constant 1.000000e+00 : f32
    %71 = vector.broadcast %cst_16 : f32 to vector<8x128xf32>
    %72 = arith.addf %71, %70 : vector<8x128xf32>
    %73 = arith.divf %71, %72 : vector<8x128xf32>
    %74 = math.tanh %68 : vector<8x128xf32>
    %75 = vector.extract_strided_slice %73 {offsets = [0, 0], sizes = [8, 32], strides = [1, 1]} : vector<8x128xf32> to vector<8x32xf32>
    %76 = vector.extract_strided_slice %73 {offsets = [0, 32], sizes = [8, 32], strides = [1, 1]} : vector<8x128xf32> to vector<8x32xf32>
    %77 = vector.extract_strided_slice %74 {offsets = [0, 64], sizes = [8, 32], strides = [1, 1]} : vector<8x128xf32> to vector<8x32xf32>
    %78 = vector.extract_strided_slice %73 {offsets = [0, 96], sizes = [8, 32], strides = [1, 1]} : vector<8x128xf32> to vector<8x32xf32>
    %79 = arith.mulf %76, %63 : vector<8x32xf32>
    %80 = arith.mulf %75, %77 : vector<8x32xf32>
    %81 = arith.addf %79, %80 : vector<8x32xf32>
    %82 = math.tanh %81 : vector<8x32xf32>
    %83 = arith.mulf %78, %82 : vector<8x32xf32>
    %84 = vector.extract_strided_slice %9 {offsets = [32, 0], sizes = [8, 128], strides = [1, 1]} : vector<64x128xf32> to vector<8x128xf32>
    %cst_17 = arith.constant dense<0.000000e+00> : vector<8x128xf32>
    %85 = tpu.matmul %83, %1, %cst_17 {dimension_numbers = #tpu.dot_dimension_numbers<[1], [0], [0], [1], [0, 0, 1, 1], [], []>} : vector<8x32xf32>, vector<32x128xf32>, vector<8x128xf32> -> vector<8x128xf32>
    %86 = arith.addf %84, %85 : vector<8x128xf32>
    %87 = arith.negf %86 : vector<8x128xf32>
    %88 = math.exp %87 : vector<8x128xf32>
    %cst_18 = arith.constant 1.000000e+00 : f32
    %89 = vector.broadcast %cst_18 : f32 to vector<8x128xf32>
    %90 = arith.addf %89, %88 : vector<8x128xf32>
    %91 = arith.divf %89, %90 : vector<8x128xf32>
    %92 = math.tanh %86 : vector<8x128xf32>
    %93 = vector.extract_strided_slice %91 {offsets = [0, 0], sizes = [8, 32], strides = [1, 1]} : vector<8x128xf32> to vector<8x32xf32>
    %94 = vector.extract_strided_slice %91 {offsets = [0, 32], sizes = [8, 32], strides = [1, 1]} : vector<8x128xf32> to vector<8x32xf32>
    %95 = vector.extract_strided_slice %92 {offsets = [0, 64], sizes = [8, 32], strides = [1, 1]} : vector<8x128xf32> to vector<8x32xf32>
    %96 = vector.extract_strided_slice %91 {offsets = [0, 96], sizes = [8, 32], strides = [1, 1]} : vector<8x128xf32> to vector<8x32xf32>
    %97 = arith.mulf %94, %81 : vector<8x32xf32>
    %98 = arith.mulf %93, %95 : vector<8x32xf32>
    %99 = arith.addf %97, %98 : vector<8x32xf32>
    %100 = math.tanh %99 : vector<8x32xf32>
    %101 = arith.mulf %96, %100 : vector<8x32xf32>
    %102 = vector.extract_strided_slice %9 {offsets = [40, 0], sizes = [8, 128], strides = [1, 1]} : vector<64x128xf32> to vector<8x128xf32>
    %cst_19 = arith.constant dense<0.000000e+00> : vector<8x128xf32>
    %103 = tpu.matmul %101, %1, %cst_19 {dimension_numbers = #tpu.dot_dimension_numbers<[1], [0], [0], [1], [0, 0, 1, 1], [], []>} : vector<8x32xf32>, vector<32x128xf32>, vector<8x128xf32> -> vector<8x128xf32>
    %104 = arith.addf %102, %103 : vector<8x128xf32>
    %105 = arith.negf %104 : vector<8x128xf32>
    %106 = math.exp %105 : vector<8x128xf32>
    %cst_20 = arith.constant 1.000000e+00 : f32
    %107 = vector.broadcast %cst_20 : f32 to vector<8x128xf32>
    %108 = arith.addf %107, %106 : vector<8x128xf32>
    %109 = arith.divf %107, %108 : vector<8x128xf32>
    %110 = math.tanh %104 : vector<8x128xf32>
    %111 = vector.extract_strided_slice %109 {offsets = [0, 0], sizes = [8, 32], strides = [1, 1]} : vector<8x128xf32> to vector<8x32xf32>
    %112 = vector.extract_strided_slice %109 {offsets = [0, 32], sizes = [8, 32], strides = [1, 1]} : vector<8x128xf32> to vector<8x32xf32>
    %113 = vector.extract_strided_slice %110 {offsets = [0, 64], sizes = [8, 32], strides = [1, 1]} : vector<8x128xf32> to vector<8x32xf32>
    %114 = vector.extract_strided_slice %109 {offsets = [0, 96], sizes = [8, 32], strides = [1, 1]} : vector<8x128xf32> to vector<8x32xf32>
    %115 = arith.mulf %112, %99 : vector<8x32xf32>
    %116 = arith.mulf %111, %113 : vector<8x32xf32>
    %117 = arith.addf %115, %116 : vector<8x32xf32>
    %118 = math.tanh %117 : vector<8x32xf32>
    %119 = arith.mulf %114, %118 : vector<8x32xf32>
    %120 = vector.extract_strided_slice %9 {offsets = [48, 0], sizes = [8, 128], strides = [1, 1]} : vector<64x128xf32> to vector<8x128xf32>
    %cst_21 = arith.constant dense<0.000000e+00> : vector<8x128xf32>
    %121 = tpu.matmul %119, %1, %cst_21 {dimension_numbers = #tpu.dot_dimension_numbers<[1], [0], [0], [1], [0, 0, 1, 1], [], []>} : vector<8x32xf32>, vector<32x128xf32>, vector<8x128xf32> -> vector<8x128xf32>
    %122 = arith.addf %120, %121 : vector<8x128xf32>
    %123 = arith.negf %122 : vector<8x128xf32>
    %124 = math.exp %123 : vector<8x128xf32>
    %cst_22 = arith.constant 1.000000e+00 : f32
    %125 = vector.broadcast %cst_22 : f32 to vector<8x128xf32>
    %126 = arith.addf %125, %124 : vector<8x128xf32>
    %127 = arith.divf %125, %126 : vector<8x128xf32>
    %128 = math.tanh %122 : vector<8x128xf32>
    %129 = vector.extract_strided_slice %127 {offsets = [0, 0], sizes = [8, 32], strides = [1, 1]} : vector<8x128xf32> to vector<8x32xf32>
    %130 = vector.extract_strided_slice %127 {offsets = [0, 32], sizes = [8, 32], strides = [1, 1]} : vector<8x128xf32> to vector<8x32xf32>
    %131 = vector.extract_strided_slice %128 {offsets = [0, 64], sizes = [8, 32], strides = [1, 1]} : vector<8x128xf32> to vector<8x32xf32>
    %132 = vector.extract_strided_slice %127 {offsets = [0, 96], sizes = [8, 32], strides = [1, 1]} : vector<8x128xf32> to vector<8x32xf32>
    %133 = arith.mulf %130, %117 : vector<8x32xf32>
    %134 = arith.mulf %129, %131 : vector<8x32xf32>
    %135 = arith.addf %133, %134 : vector<8x32xf32>
    %136 = math.tanh %135 : vector<8x32xf32>
    %137 = arith.mulf %132, %136 : vector<8x32xf32>
    %138 = vector.extract_strided_slice %9 {offsets = [56, 0], sizes = [8, 128], strides = [1, 1]} : vector<64x128xf32> to vector<8x128xf32>
    %cst_23 = arith.constant dense<0.000000e+00> : vector<8x128xf32>
    %139 = tpu.matmul %137, %1, %cst_23 {dimension_numbers = #tpu.dot_dimension_numbers<[1], [0], [0], [1], [0, 0, 1, 1], [], []>} : vector<8x32xf32>, vector<32x128xf32>, vector<8x128xf32> -> vector<8x128xf32>
    %140 = arith.addf %138, %139 : vector<8x128xf32>
    %141 = arith.negf %140 : vector<8x128xf32>
    %142 = math.exp %141 : vector<8x128xf32>
    %cst_24 = arith.constant 1.000000e+00 : f32
    %143 = vector.broadcast %cst_24 : f32 to vector<8x128xf32>
    %144 = arith.addf %143, %142 : vector<8x128xf32>
    %145 = arith.divf %143, %144 : vector<8x128xf32>
    %146 = math.tanh %140 : vector<8x128xf32>
    %147 = vector.extract_strided_slice %145 {offsets = [0, 0], sizes = [8, 32], strides = [1, 1]} : vector<8x128xf32> to vector<8x32xf32>
    %148 = vector.extract_strided_slice %145 {offsets = [0, 32], sizes = [8, 32], strides = [1, 1]} : vector<8x128xf32> to vector<8x32xf32>
    %149 = vector.extract_strided_slice %146 {offsets = [0, 64], sizes = [8, 32], strides = [1, 1]} : vector<8x128xf32> to vector<8x32xf32>
    %150 = vector.extract_strided_slice %145 {offsets = [0, 96], sizes = [8, 32], strides = [1, 1]} : vector<8x128xf32> to vector<8x32xf32>
    %151 = arith.mulf %148, %135 : vector<8x32xf32>
    %152 = arith.mulf %147, %149 : vector<8x32xf32>
    %153 = arith.addf %151, %152 : vector<8x32xf32>
    %154 = math.tanh %153 : vector<8x32xf32>
    %155 = arith.mulf %150, %154 : vector<8x32xf32>
    %156 = vector.extract_strided_slice %9 {offsets = [56, 0], sizes = [8, 128], strides = [1, 1]} : vector<64x128xf32> to vector<8x128xf32>
    %cst_25 = arith.constant dense<0.000000e+00> : vector<8x128xf32>
    %157 = tpu.matmul %155, %1, %cst_25 {dimension_numbers = #tpu.dot_dimension_numbers<[1], [0], [0], [1], [0, 0, 1, 1], [], []>} : vector<8x32xf32>, vector<32x128xf32>, vector<8x128xf32> -> vector<8x128xf32>
    %158 = arith.addf %156, %157 : vector<8x128xf32>
    %159 = arith.negf %158 : vector<8x128xf32>
    %160 = math.exp %159 : vector<8x128xf32>
    %cst_26 = arith.constant 1.000000e+00 : f32
    %161 = vector.broadcast %cst_26 : f32 to vector<8x128xf32>
    %162 = arith.addf %161, %160 : vector<8x128xf32>
    %163 = arith.divf %161, %162 : vector<8x128xf32>
    %164 = math.tanh %158 : vector<8x128xf32>
    %165 = vector.extract_strided_slice %163 {offsets = [0, 0], sizes = [8, 32], strides = [1, 1]} : vector<8x128xf32> to vector<8x32xf32>
    %166 = vector.extract_strided_slice %163 {offsets = [0, 32], sizes = [8, 32], strides = [1, 1]} : vector<8x128xf32> to vector<8x32xf32>
    %167 = vector.extract_strided_slice %164 {offsets = [0, 64], sizes = [8, 32], strides = [1, 1]} : vector<8x128xf32> to vector<8x32xf32>
    %168 = vector.extract_strided_slice %163 {offsets = [0, 96], sizes = [8, 32], strides = [1, 1]} : vector<8x128xf32> to vector<8x32xf32>
    %169 = arith.mulf %166, %153 : vector<8x32xf32>
    %170 = arith.mulf %165, %167 : vector<8x32xf32>
    %171 = arith.addf %169, %170 : vector<8x32xf32>
    %172 = math.tanh %171 : vector<8x32xf32>
    %173 = arith.mulf %168, %172 : vector<8x32xf32>
    %174 = vector.broadcast %4 : vector<1x32xf32> to vector<8x32xf32>
    %175 = arith.mulf %173, %174 : vector<8x32xf32>
    %cst_27 = arith.constant dense<0.000000e+00> : vector<8xf32>
    %176 = vector.multi_reduction <add>, %175, %cst_27 [1] : vector<8x32xf32> to vector<8xf32>
    %177 = vector.shape_cast %176 : vector<8xf32> to vector<8x1xf32>
    %cst_28 = arith.constant dense<0.000000e+00> : vector<8x128xf32>
    %178 = tpu.matmul %173, %1, %cst_28 {dimension_numbers = #tpu.dot_dimension_numbers<[1], [0], [0], [1], [0, 0, 1, 1], [], []>} : vector<8x32xf32>, vector<32x128xf32>, vector<8x128xf32> -> vector<8x128xf32>
    %179 = arith.addf %156, %178 : vector<8x128xf32>
    %180 = arith.negf %179 : vector<8x128xf32>
    %181 = math.exp %180 : vector<8x128xf32>
    %cst_29 = arith.constant 1.000000e+00 : f32
    %182 = vector.broadcast %cst_29 : f32 to vector<8x128xf32>
    %183 = arith.addf %182, %181 : vector<8x128xf32>
    %184 = arith.divf %182, %183 : vector<8x128xf32>
    %185 = math.tanh %179 : vector<8x128xf32>
    %186 = vector.extract_strided_slice %184 {offsets = [0, 0], sizes = [8, 32], strides = [1, 1]} : vector<8x128xf32> to vector<8x32xf32>
    %187 = vector.extract_strided_slice %184 {offsets = [0, 32], sizes = [8, 32], strides = [1, 1]} : vector<8x128xf32> to vector<8x32xf32>
    %188 = vector.extract_strided_slice %185 {offsets = [0, 64], sizes = [8, 32], strides = [1, 1]} : vector<8x128xf32> to vector<8x32xf32>
    %189 = vector.extract_strided_slice %184 {offsets = [0, 96], sizes = [8, 32], strides = [1, 1]} : vector<8x128xf32> to vector<8x32xf32>
    %190 = arith.mulf %187, %171 : vector<8x32xf32>
    %191 = arith.mulf %186, %188 : vector<8x32xf32>
    %192 = arith.addf %190, %191 : vector<8x32xf32>
    %193 = math.tanh %192 : vector<8x32xf32>
    %194 = arith.mulf %189, %193 : vector<8x32xf32>
    %195 = vector.broadcast %4 : vector<1x32xf32> to vector<8x32xf32>
    %196 = arith.mulf %194, %195 : vector<8x32xf32>
    %cst_30 = arith.constant dense<0.000000e+00> : vector<8xf32>
    %197 = vector.multi_reduction <add>, %196, %cst_30 [1] : vector<8x32xf32> to vector<8xf32>
    %198 = vector.shape_cast %197 : vector<8xf32> to vector<8x1xf32>
    %cst_31 = arith.constant dense<0.000000e+00> : vector<8x128xf32>
    %199 = tpu.matmul %194, %1, %cst_31 {dimension_numbers = #tpu.dot_dimension_numbers<[1], [0], [0], [1], [0, 0, 1, 1], [], []>} : vector<8x32xf32>, vector<32x128xf32>, vector<8x128xf32> -> vector<8x128xf32>
    %200 = arith.addf %156, %199 : vector<8x128xf32>
    %201 = arith.negf %200 : vector<8x128xf32>
    %202 = math.exp %201 : vector<8x128xf32>
    %cst_32 = arith.constant 1.000000e+00 : f32
    %203 = vector.broadcast %cst_32 : f32 to vector<8x128xf32>
    %204 = arith.addf %203, %202 : vector<8x128xf32>
    %205 = arith.divf %203, %204 : vector<8x128xf32>
    %206 = math.tanh %200 : vector<8x128xf32>
    %207 = vector.extract_strided_slice %205 {offsets = [0, 0], sizes = [8, 32], strides = [1, 1]} : vector<8x128xf32> to vector<8x32xf32>
    %208 = vector.extract_strided_slice %205 {offsets = [0, 32], sizes = [8, 32], strides = [1, 1]} : vector<8x128xf32> to vector<8x32xf32>
    %209 = vector.extract_strided_slice %206 {offsets = [0, 64], sizes = [8, 32], strides = [1, 1]} : vector<8x128xf32> to vector<8x32xf32>
    %210 = vector.extract_strided_slice %205 {offsets = [0, 96], sizes = [8, 32], strides = [1, 1]} : vector<8x128xf32> to vector<8x32xf32>
    %211 = arith.mulf %208, %192 : vector<8x32xf32>
    %212 = arith.mulf %207, %209 : vector<8x32xf32>
    %213 = arith.addf %211, %212 : vector<8x32xf32>
    %214 = math.tanh %213 : vector<8x32xf32>
    %215 = arith.mulf %210, %214 : vector<8x32xf32>
    %216 = vector.broadcast %4 : vector<1x32xf32> to vector<8x32xf32>
    %217 = arith.mulf %215, %216 : vector<8x32xf32>
    %cst_33 = arith.constant dense<0.000000e+00> : vector<8xf32>
    %218 = vector.multi_reduction <add>, %217, %cst_33 [1] : vector<8x32xf32> to vector<8xf32>
    %219 = vector.shape_cast %218 : vector<8xf32> to vector<8x1xf32>
    %cst_34 = arith.constant dense<0.000000e+00> : vector<8x128xf32>
    %220 = tpu.matmul %215, %1, %cst_34 {dimension_numbers = #tpu.dot_dimension_numbers<[1], [0], [0], [1], [0, 0, 1, 1], [], []>} : vector<8x32xf32>, vector<32x128xf32>, vector<8x128xf32> -> vector<8x128xf32>
    %221 = arith.addf %156, %220 : vector<8x128xf32>
    %222 = arith.negf %221 : vector<8x128xf32>
    %223 = math.exp %222 : vector<8x128xf32>
    %cst_35 = arith.constant 1.000000e+00 : f32
    %224 = vector.broadcast %cst_35 : f32 to vector<8x128xf32>
    %225 = arith.addf %224, %223 : vector<8x128xf32>
    %226 = arith.divf %224, %225 : vector<8x128xf32>
    %227 = math.tanh %221 : vector<8x128xf32>
    %228 = vector.extract_strided_slice %226 {offsets = [0, 0], sizes = [8, 32], strides = [1, 1]} : vector<8x128xf32> to vector<8x32xf32>
    %229 = vector.extract_strided_slice %226 {offsets = [0, 32], sizes = [8, 32], strides = [1, 1]} : vector<8x128xf32> to vector<8x32xf32>
    %230 = vector.extract_strided_slice %227 {offsets = [0, 64], sizes = [8, 32], strides = [1, 1]} : vector<8x128xf32> to vector<8x32xf32>
    %231 = vector.extract_strided_slice %226 {offsets = [0, 96], sizes = [8, 32], strides = [1, 1]} : vector<8x128xf32> to vector<8x32xf32>
    %232 = arith.mulf %229, %213 : vector<8x32xf32>
    %233 = arith.mulf %228, %230 : vector<8x32xf32>
    %234 = arith.addf %232, %233 : vector<8x32xf32>
    %235 = math.tanh %234 : vector<8x32xf32>
    %236 = arith.mulf %231, %235 : vector<8x32xf32>
    %237 = vector.broadcast %4 : vector<1x32xf32> to vector<8x32xf32>
    %238 = arith.mulf %236, %237 : vector<8x32xf32>
    %cst_36 = arith.constant dense<0.000000e+00> : vector<8xf32>
    %239 = vector.multi_reduction <add>, %238, %cst_36 [1] : vector<8x32xf32> to vector<8xf32>
    %240 = vector.shape_cast %239 : vector<8xf32> to vector<8x1xf32>
    %cst_37 = arith.constant dense<0.000000e+00> : vector<8x128xf32>
    %241 = tpu.matmul %236, %1, %cst_37 {dimension_numbers = #tpu.dot_dimension_numbers<[1], [0], [0], [1], [0, 0, 1, 1], [], []>} : vector<8x32xf32>, vector<32x128xf32>, vector<8x128xf32> -> vector<8x128xf32>
    %242 = arith.addf %156, %241 : vector<8x128xf32>
    %243 = arith.negf %242 : vector<8x128xf32>
    %244 = math.exp %243 : vector<8x128xf32>
    %cst_38 = arith.constant 1.000000e+00 : f32
    %245 = vector.broadcast %cst_38 : f32 to vector<8x128xf32>
    %246 = arith.addf %245, %244 : vector<8x128xf32>
    %247 = arith.divf %245, %246 : vector<8x128xf32>
    %248 = math.tanh %242 : vector<8x128xf32>
    %249 = vector.extract_strided_slice %247 {offsets = [0, 0], sizes = [8, 32], strides = [1, 1]} : vector<8x128xf32> to vector<8x32xf32>
    %250 = vector.extract_strided_slice %247 {offsets = [0, 32], sizes = [8, 32], strides = [1, 1]} : vector<8x128xf32> to vector<8x32xf32>
    %251 = vector.extract_strided_slice %248 {offsets = [0, 64], sizes = [8, 32], strides = [1, 1]} : vector<8x128xf32> to vector<8x32xf32>
    %252 = vector.extract_strided_slice %247 {offsets = [0, 96], sizes = [8, 32], strides = [1, 1]} : vector<8x128xf32> to vector<8x32xf32>
    %253 = arith.mulf %250, %234 : vector<8x32xf32>
    %254 = arith.mulf %249, %251 : vector<8x32xf32>
    %255 = arith.addf %253, %254 : vector<8x32xf32>
    %256 = math.tanh %255 : vector<8x32xf32>
    %257 = arith.mulf %252, %256 : vector<8x32xf32>
    %258 = vector.broadcast %4 : vector<1x32xf32> to vector<8x32xf32>
    %259 = arith.mulf %257, %258 : vector<8x32xf32>
    %cst_39 = arith.constant dense<0.000000e+00> : vector<8xf32>
    %260 = vector.multi_reduction <add>, %259, %cst_39 [1] : vector<8x32xf32> to vector<8xf32>
    %261 = vector.shape_cast %260 : vector<8xf32> to vector<8x1xf32>
    %262 = tpu.concatenate %177, %198, %219, %240, %261 in 1 : vector<8x1xf32>, vector<8x1xf32>, vector<8x1xf32>, vector<8x1xf32>, vector<8x1xf32> -> vector<8x5xf32>
    %263 = vector.broadcast %5 : vector<1x1xf32> to vector<8x5xf32>
    %264 = arith.addf %262, %263 : vector<8x5xf32>
    %c0_40 = arith.constant 0 : index
    %c0_41 = arith.constant 0 : index
    %265 = vector.load %arg4[%c0_40, %c0_41] : memref<8x5xf32, #tpu.memory_space<vmem>>, vector<8x5xf32>
    tpu.vector_store %arg4[%c0_40, %c0_41], %264 {strides = array<i32>} : memref<8x5xf32, #tpu.memory_space<vmem>>, vector<8x5xf32>,
    return
  }
}

</mosaic_0001>

<bundles_post_ra>
// kernel: tpu_custom_call.1
= control target key start
LH: loop header
LB: loop body
LE: loop exit
PB: predicated region body
PF: predicated region fallthrough
CT: control target
= control target key end

     0   :  { %vm61_vm0 = vcmask 1043456   ;;  %v2026_v3 = vmov 0.0|0.0   ;;  %vm36_vm1 = vcmask 31744   ;;  %s2324_s0 = inlined_call_operand.vmem [shape: f32[64,4], index: 0, kind: input, shape index: {}]   ;;  %s2325_s1 = inlined_call_operand.vmem [shape: f32[4,128], index: 1, kind: input, shape index: {}]   ;;  %s2326_s2 = inlined_call_operand.vmem [shape: f32[32,128], index: 2, kind: input, shape index: {}]   ;;  %s2327_s3 = inlined_call_operand.vmem [shape: f32[8,128], index: 3, kind: input, shape index: {}]   ;;  %s2328_s4 = inlined_call_operand.hbm [shape: f32[8,5], index: 4, kind: output, shape index: {}]  }
   0x1   :  { %v19_v0 = vld [vmem:[%s2326_s2] sm:$0xff]  ;;  %v20_v1 = vld [vmem:[%s2326_s2 + $0x8] sm:$0xff]  ;;  %1811 = vmatprep.subr.bf16.mxu1 %v2026_v3  ;;  %v21_v7 = vld [vmem:[%s2326_s2 + $0x10] sm:$0xff] }
   0x2   :  { %v18_v2 = vld [vmem:[%s2325_s1] sm:$0xf]  ;;  %v2068_v4 = vpack.c.bf16 %v20_v1, %v19_v0  ;;  %v25_v6 = vld [vmem:[%s2324_s0 + $0x8] sm:$0xff]  ;;  %v22_v8 = vld [vmem:[%s2326_s2 + $0x18] sm:$0xff] }
   0x3   :  { %1654 = vmatprep.subr.msk.mxu0 %vm61_vm0, %v18_v2  ;;  %v24_v5 = vld [vmem:[%s2324_s0] sm:$0xff] }
   0x4   :  { %1655 = vmatpush3.msk.msra.mxu0 %vm61_vm0, %v18_v2  ;;  %1656 = vmatprep.mubr.msk.f32.mxu0 %vm36_vm1, %v24_v5 }
   0x5   :  { %9 = vsyncpa [#allocation3], 0  ;;  %1813 = vmatpush3.bf16.msra.mxu1 %v2068_v4  ;;  %1657 = vmatmul.mubr.msk.f32.vlgmr.msra.gmra.mrb[0].mxu0 %vm36_vm1, %v25_v6  ;;  %v2085_v9 = vpack.c.bf16 %v22_v8, %v21_v7  ;;  %vm2027_vm2 = vmmov 0   ;;  %v2028_v10 = vmov 0.0   ;;  %v32_v11 = vlaneseq  ;;  %v2110_v14 = vld [vmem:[%s2327_s3] sm:$0xff]  ;;  %s2029_s29 = smov 64  }
   0x6   :  { %1814 = vmatprep.subr.bf16.mxu1 %v2026_v3  ;;  %1676 = vmatprep.mubr.msk.f32.mxu1 %vm2027_vm2, %v2028_v10  ;;  %s2030_s3 = smov 32   ;;  %vm170_vm3 = vcmask 261120   ;;  %v26_v50 = vld [vmem:[%s2324_s0 + $0x10] sm:$0xff]  ;;  %v27_v51 = vld [vmem:[%s2324_s0 + $0x18] sm:$0xff]  ;;  %v28_v52 = vld [vmem:[%s2324_s0 + $0x20] sm:$0xff]  ;;  %vm1517_vm4 = vcmask 7168  }
   0x7   :  { %1823 = vmatprep.subr.bf16.mxu0 %v2026_v3  ;;  %v2104_v12 = vshrl.u32 %v32_v11, 7  ;;  %1659 = vmatprep.mubr.msk.f32.mxu0 %vm36_vm1, %v26_v50  ;;  %v29_v53 = vld [vmem:[%s2324_s0 + $0x28] sm:$0xff]  ;;  %v30_v54 = vld [vmem:[%s2324_s0 + $0x30] sm:$0xff]  ;;  %v31_v55 = vld [vmem:[%s2324_s0 + $0x38] sm:$0xff]  ;;  %s2031_s0 = smov 96   ;;  %vm1519_vm5 = vcmask 15360  }
   0x8   :  { %1825 = vmatpush3.bf16.msra.mxu0 %v2068_v4  ;;  %vm1521_vm6 = vcmask 23552   ;;  %s2032_s17 = smov [#allocation2]   ;;  %vm1530_vm7 = vcmask 39936  }
   0x9   :  { %1816 = vmatpush3.bf16.msra.mxu1 %v2085_v9  ;;  %1826 = vmatprep.subr.bf16.mxu0 %v2026_v3  ;;  %v34_v13 = vsub.s32 0, %v2104_v12  ;;  %s1538_s18 = sshll.u32 %s2032_s17, 4  ;;  %s1539_s18 = int_to_ptr.vmem [resolvable:$true] %s1538_s18 }
   0xa   :  { %1817 = vmatprep.subr.bf16.mxu1 %v2026_v3  ;;  %1660 = vmatmul.mubr.msk.f32.gmra.mrb[2].mxu0 %vm36_vm1, %v27_v51  ;;  %s2002_s19 = scalar_lea.vmem %s1539_s18, 128  ;;  %p2007_p1 = scmp.lt.s32.totalorder %s1539_s18, %s1539_s18 }
   0xb   :  { %v2113_v15 = vrot.slane %v2110_v14, %v34_v13  ;;  %1662 = vmatprep.mubr.msk.f32.mxu0 %vm36_vm1, %v28_v52  ;;  %p2003_p0 = scmp.ne.s32.totalorder %s1539_s18, %s2002_s19  ;;  %p2008_p2 = scmp.lt.s32.totalorder %s2002_s19, %s2002_s19 }
   0xc   :  { %1677 = vmatmul.mubr.f32.vlgmr.msra.gmra.mrb[0].mxu1 %v2028_v10  ;;  %1828 = vmatpush3.bf16.msra.mxu0 %v2085_v9 }
   0xd   :  { %1819 = vmatpush3.bf16.msra.mxu1 %v2068_v4  ;;  %1687 = vmatprep.mubr.msk.f32.mxu1 %vm2027_vm2, %v2028_v10  ;;  %p2009_p3 = por %p2008_p2, %p2007_p1 }
   0xe   :  { %1820 = vmatprep.subr.bf16.mxu1 %v2026_v3  ;;  %1835 = vmatprep.subr.bf16.mxu0 %v2026_v3 }
   0xf   :  { %1663 = vmatmul.mubr.msk.f32.gmra.mrb[4].mxu0 %vm36_vm1, %v29_v53  ;;  %p2010_p4 = pnand %p2009_p3, %p2003_p0 }
  0x10   :  { %1665 = vmatprep.mubr.msk.f32.mxu0 %vm36_vm1, %v30_v54 }
  0x11   :  { %1822 = vmatpush3.bf16.msra.mxu1 %v2085_v9 }
  0x12   :  { %1829 = vmatprep.subr.bf16.mxu1 %v2026_v3 }
  0x13   :  { %1666 = vmatmul.mubr.msk.f32.gmra.mrb[6].mxu0 %vm36_vm1, %v31_v55 }
  0x14   :  { %1698 = vmatprep.mubr.msk.f32.mxu0 %vm2027_vm2, %v2028_v10 }
  0xd8   :  { %v1658_v16 = vpop.f32.mrb[0].mxu0 }
  0xd9   :  { %v131_v17 = vpop.f32.mrb[1].mxu0  ;;  %v137_v36 = vadd.f32 %v1658_v16, %v2113_v15 }
  0xda   :  { %v132_v18 = vadd.f32 %v131_v17, %v2113_v15 }
  0xdd   :  { %v1661_v59 = vpop.f32.mrb[2].mxu0 }
  0xde   :  { %v141_v60 = vpop.f32.mrb[3].mxu0 }
  0xdf   :  { %v240_v19 = vpop.f32.mrb[0].mxu1  ;;  %v142_v2 = vadd.f32 %v141_v60, %v2113_v15 }
  0xe0   :  { %v244_v20 = vadd.f32 %v240_v19, %v132_v18  ;;  %v1678_v21 = vpop.f32.mrb[1].mxu1 }
  0xe2   :  { %1898 = vtanh.f32 %v244_v20  ;;  %v1555_v23 = vmul.f32 -1.442695, %v244_v20  ;;  %v2158_v61 = vpop.f32.mrb[4].mxu0 }
  0xe3   :  { %v2160_v62 = vpop.f32.mrb[5].mxu0 }
  0xe4   :  { %1900 = vpow2.f32 %v1555_v23 }
  0xe6   :  { %v2162_v63 = vpop.f32.mrb[6].mxu0 }
  0xe7   :  { %v2164_v0 = vpop.f32.mrb[7].mxu0 }
  0xec   :  { %v1899_v22 = vpop.eup %1898 }
  0xed   :  { %254 = vrot.lane.b32.xlu0 %v1899_v22, %s2029_s29 }
  0xee   :  { %v1901_v24 = vpop.eup %1900 }
  0xef   :  { %v248_v25 = vadd.f32 1.0, %v1901_v24 }
  0xf1   :  { %1902 = vrcp.f32 %v248_v25 }
  0xfb   :  { %v1903_v26 = vpop.eup %1902 }
  0xfc   :  { %v252_v29 = vmul.f32 0.0, %v1903_v26 }
 0x15f   :  { %v255_v27 = vpop.permute.xlu0 %254 }
 0x160   :  { %v257_v28 = vmul.f32 %v1903_v26, %v255_v27  ;;  %v147_v27 = vadd.f32 %v1661_v59, %v2113_v15 }
 0x162   :  { %259 = vrot.lane.b32.xlu0 %v257_v28, %s2030_s3 }
 0x1d4   :  { %v260_v30 = vpop.permute.xlu0 %259 }
 0x1d5   :  { %v262_v31 = vadd.f32 %v260_v30, %v252_v29 }
 0x1d7   :  { %1904 = vtanh.f32 %v262_v31 }
 0x1e1   :  { %v1905_v32 = vpop.eup %1904 }
 0x1e2   :  { %265 = vrot.lane.b32.xlu1 %v1905_v32, %s2029_s29 }
 0x254   :  { %v266_v33 = vpop.permute.xlu1 %265 }
 0x255   :  { %v268_v34 = vmul.f32 %v1903_v26, %v266_v33 }
 0x257   :  { %270 = vrot.lane.b32.xlu1 %v268_v34, %s2030_s3 }
 0x2c9   :  { %v271_v35 = vpop.permute.xlu1 %270 }
 0x2ca   :  { %1688 = vmatmul.mubr.msk.f32.vlgmr.msra.gmra.mrb[2].mxu1 %vm170_vm3, %v271_v35 }
 0x2cb   :  { %1831 = vmatpush3.bf16.msra.mxu1 %v2068_v4  ;;  %1709 = vmatprep.mubr.msk.f32.mxu1 %vm2027_vm2, %v2028_v10 }
 0x2cc   :  { %1832 = vmatprep.subr.bf16.mxu1 %v2026_v3 }
 0x2cf   :  { %1834 = vmatpush3.bf16.msra.mxu1 %v2085_v9 }
 0x2d0   :  { %1841 = vmatprep.subr.bf16.mxu1 %v2026_v3 }
 0x39d   :  { %v340_v37 = vpop.f32.mrb[2].mxu1 }
 0x39e   :  { %v344_v38 = vadd.f32 %v340_v37, %v137_v36  ;;  %v1689_v39 = vpop.f32.mrb[3].mxu1 }
 0x3a0   :  { %1906 = vtanh.f32 %v344_v38  ;;  %v1557_v41 = vmul.f32 -1.442695, %v344_v38 }
 0x3a2   :  { %1908 = vpow2.f32 %v1557_v41 }
 0x3aa   :  { %v1907_v40 = vpop.eup %1906 }
 0x3ab   :  { %354 = vrot.lane.b32.xlu0 %v1907_v40, %s2029_s29 }
 0x3ac   :  { %v1909_v42 = vpop.eup %1908 }
 0x3ad   :  { %v348_v43 = vadd.f32 1.0, %v1909_v42 }
 0x3af   :  { %1910 = vrcp.f32 %v348_v43 }
 0x3b9   :  { %v1911_v44 = vpop.eup %1910 }
 0x3ba   :  { %v352_v47 = vmul.f32 %v1911_v44, %v262_v31 }
 0x41d   :  { %v355_v45 = vpop.permute.xlu0 %354 }
 0x41e   :  { %v357_v46 = vmul.f32 %v1911_v44, %v355_v45  ;;  %v152_v45 = vadd.f32 %v2160_v62, %v2113_v15 }
 0x420   :  { %359 = vrot.lane.b32.xlu1 %v357_v46, %s2030_s3 }
 0x492   :  { %v360_v48 = vpop.permute.xlu1 %359 }
 0x493   :  { %v362_v49 = vadd.f32 %v360_v48, %v352_v47 }
 0x495   :  { %1912 = vtanh.f32 %v362_v49 }
 0x49f   :  { %v1913_v56 = vpop.eup %1912 }
 0x4a0   :  { %365 = vrot.lane.b32.xlu0 %v1913_v56, %s2029_s29 }
 0x512   :  { %v366_v57 = vpop.permute.xlu0 %365 }
 0x513   :  { %v368_v58 = vmul.f32 %v1911_v44, %v366_v57 }
 0x515   :  { %370 = vrot.lane.b32.xlu1 %v368_v58, %s2030_s3 }
 0x587   :  { %v371_v1 = vpop.permute.xlu1 %370 }
 0x588   :  { %1699 = vmatmul.mubr.msk.f32.vlgmr.msra.gmra.mrb[8].mxu0 %vm170_vm3, %v371_v1 }
 0x589   :  { %1837 = vmatpush3.bf16.msra.mxu0 %v2068_v4  ;;  %1720 = vmatprep.mubr.msk.f32.mxu0 %vm2027_vm2, %v2028_v10 }
 0x58a   :  { %1838 = vmatprep.subr.bf16.mxu0 %v2026_v3 }
 0x58d   :  { %1840 = vmatpush3.bf16.msra.mxu0 %v2085_v9 }
 0x58e   :  { %1847 = vmatprep.subr.bf16.mxu0 %v2026_v3 }
 0x65b   :  { %v440_v5 = vpop.f32.mrb[8].mxu0 }
 0x65c   :  { %v444_v6 = vadd.f32 %v440_v5, %v142_v2  ;;  %v1700_v7 = vpop.f32.mrb[9].mxu0  ;;  %v157_v2 = vadd.f32 %v2158_v61, %v2113_v15 }
 0x65e   :  { %1914 = vtanh.f32 %v444_v6  ;;  %v1559_v11 = vmul.f32 -1.442695, %v444_v6 }
 0x660   :  { %1916 = vpow2.f32 %v1559_v11 }
 0x668   :  { %v1915_v8 = vpop.eup %1914 }
 0x669   :  { %454 = vrot.lane.b32.xlu0 %v1915_v8, %s2029_s29 }
 0x66a   :  { %v1917_v13 = vpop.eup %1916 }
 0x66b   :  { %v448_v16 = vadd.f32 1.0, %v1917_v13 }
 0x66d   :  { %1918 = vrcp.f32 %v448_v16 }
 0x677   :  { %v1919_v17 = vpop.eup %1918 }
 0x678   :  { %v452_v20 = vmul.f32 %v1919_v17, %v362_v49 }
 0x6db   :  { %v455_v18 = vpop.permute.xlu0 %454 }
 0x6dc   :  { %v457_v19 = vmul.f32 %v1919_v17, %v455_v18 }
 0x6de   :  { %459 = vrot.lane.b32.xlu1 %v457_v19, %s2030_s3 }
 0x750   :  { %v460_v21 = vpop.permute.xlu1 %459 }
 0x751   :  { %v462_v22 = vadd.f32 %v460_v21, %v452_v20 }
 0x753   :  { %1920 = vtanh.f32 %v462_v22 }
 0x75d   :  { %v1921_v23 = vpop.eup %1920 }
 0x75e   :  { %465 = vrot.lane.b32.xlu0 %v1921_v23, %s2029_s29 }
 0x7d0   :  { %v466_v24 = vpop.permute.xlu0 %465 }
 0x7d1   :  { %v468_v25 = vmul.f32 %v1919_v17, %v466_v24 }
 0x7d3   :  { %470 = vrot.lane.b32.xlu1 %v468_v25, %s2030_s3 }
 0x845   :  { %v471_v26 = vpop.permute.xlu1 %470 }
 0x846   :  { %1710 = vmatmul.mubr.msk.f32.vlgmr.msra.gmra.mrb[4].mxu1 %vm170_vm3, %v471_v26  ;;  %v162_v26 = vadd.f32 %v2164_v0, %v2113_v15 }
 0x847   :  { %1843 = vmatpush3.bf16.msra.mxu1 %v2068_v4  ;;  %1731 = vmatprep.mubr.msk.f32.mxu1 %vm2027_vm2, %v2028_v10 }
 0x848   :  { %1844 = vmatprep.subr.bf16.mxu1 %v2026_v3 }
 0x84b   :  { %1846 = vmatpush3.bf16.msra.mxu1 %v2085_v9 }
 0x84c   :  { %1853 = vmatprep.subr.bf16.mxu1 %v2026_v3 }
 0x919   :  { %v540_v28 = vpop.f32.mrb[4].mxu1 }
 0x91a   :  { %v544_v29 = vadd.f32 %v540_v28, %v147_v27  ;;  %v1711_v30 = vpop.f32.mrb[5].mxu1 }
 0x91c   :  { %1922 = vtanh.f32 %v544_v29  ;;  %v1561_v32 = vmul.f32 -1.442695, %v544_v29 }
 0x91e   :  { %1924 = vpow2.f32 %v1561_v32 }
 0x926   :  { %v1923_v31 = vpop.eup %1922 }
 0x927   :  { %554 = vrot.lane.b32.xlu0 %v1923_v31, %s2029_s29 }
 0x928   :  { %v1925_v33 = vpop.eup %1924 }
 0x929   :  { %v548_v34 = vadd.f32 1.0, %v1925_v33 }
 0x92b   :  { %1926 = vrcp.f32 %v548_v34 }
 0x935   :  { %v1927_v35 = vpop.eup %1926 }
 0x936   :  { %v552_v38 = vmul.f32 %v1927_v35, %v462_v22 }
 0x999   :  { %v555_v36 = vpop.permute.xlu0 %554 }
 0x99a   :  { %v557_v37 = vmul.f32 %v1927_v35, %v555_v36 }
 0x99c   :  { %559 = vrot.lane.b32.xlu1 %v557_v37, %s2030_s3 }
 0xa0e   :  { %v560_v39 = vpop.permute.xlu1 %559 }
 0xa0f   :  { %v562_v40 = vadd.f32 %v560_v39, %v552_v38 }
 0xa11   :  { %1928 = vtanh.f32 %v562_v40 }
 0xa1b   :  { %v1929_v41 = vpop.eup %1928 }
 0xa1c   :  { %565 = vrot.lane.b32.xlu0 %v1929_v41, %s2029_s29 }
 0xa8e   :  { %v566_v42 = vpop.permute.xlu0 %565 }
 0xa8f   :  { %v568_v43 = vmul.f32 %v1927_v35, %v566_v42 }
 0xa91   :  { %570 = vrot.lane.b32.xlu1 %v568_v43, %s2030_s3  ;;  %v2238_v43 = vadd.f32 %v2162_v63, %v2113_v15 }
 0xb03   :  { %v571_v44 = vpop.permute.xlu1 %570 }
 0xb04   :  { %1721 = vmatmul.mubr.msk.f32.vlgmr.msra.gmra.mrb[10].mxu0 %vm170_vm3, %v571_v44 }
 0xb05   :  { %1849 = vmatpush3.bf16.msra.mxu0 %v2068_v4  ;;  %1742 = vmatprep.mubr.msk.f32.mxu0 %vm2027_vm2, %v2028_v10 }
 0xb06   :  { %1850 = vmatprep.subr.bf16.mxu0 %v2026_v3 }
 0xb09   :  { %1852 = vmatpush3.bf16.msra.mxu0 %v2085_v9 }
 0xb0a   :  { %1859 = vmatprep.subr.bf16.mxu0 %v2026_v3 }
 0xbd7   :  { %v640_v46 = vpop.f32.mrb[10].mxu0 }
 0xbd8   :  { %v644_v47 = vadd.f32 %v640_v46, %v152_v45  ;;  %v1722_v48 = vpop.f32.mrb[11].mxu0 }
 0xbda   :  { %1930 = vtanh.f32 %v644_v47  ;;  %v1563_v50 = vmul.f32 -1.442695, %v644_v47 }
 0xbdc   :  { %1932 = vpow2.f32 %v1563_v50 }
 0xbe4   :  { %v1931_v49 = vpop.eup %1930 }
 0xbe5   :  { %654 = vrot.lane.b32.xlu0 %v1931_v49, %s2029_s29 }
 0xbe6   :  { %v1933_v51 = vpop.eup %1932 }
 0xbe7   :  { %v648_v52 = vadd.f32 1.0, %v1933_v51 }
 0xbe9   :  { %1934 = vrcp.f32 %v648_v52 }
 0xbf3   :  { %v1935_v53 = vpop.eup %1934 }
 0xbf4   :  { %v652_v56 = vmul.f32 %v1935_v53, %v562_v40 }
 0xc57   :  { %v655_v54 = vpop.permute.xlu0 %654 }
 0xc58   :  { %v657_v55 = vmul.f32 %v1935_v53, %v655_v54 }
 0xc5a   :  { %659 = vrot.lane.b32.xlu1 %v657_v55, %s2030_s3 }
 0xccc   :  { %v660_v57 = vpop.permute.xlu1 %659 }
 0xccd   :  { %v662_v58 = vadd.f32 %v660_v57, %v652_v56 }
 0xccf   :  { %1936 = vtanh.f32 %v662_v58 }
 0xcd9   :  { %v1937_v59 = vpop.eup %1936 }
 0xcda   :  { %665 = vrot.lane.b32.xlu0 %v1937_v59, %s2029_s29 }
 0xd4c   :  { %v666_v60 = vpop.permute.xlu0 %665 }
 0xd4d   :  { %v668_v62 = vmul.f32 %v1935_v53, %v666_v60 }
 0xd4f   :  { %670 = vrot.lane.b32.xlu1 %v668_v62, %s2030_s3 }
 0xdc1   :  { %v671_v1 = vpop.permute.xlu1 %670 }
 0xdc2   :  { %1732 = vmatmul.mubr.msk.f32.vlgmr.msra.gmra.mrb[6].mxu1 %vm170_vm3, %v671_v1 }
 0xdc3   :  { %1855 = vmatpush3.bf16.msra.mxu1 %v2068_v4  ;;  %1753 = vmatprep.mubr.msk.f32.mxu1 %vm2027_vm2, %v2028_v10 }
 0xdc4   :  { %1856 = vmatprep.subr.bf16.mxu1 %v2026_v3 }
 0xdc7   :  { %1858 = vmatpush3.bf16.msra.mxu1 %v2085_v9 }
 0xdc8   :  { %1865 = vmatprep.subr.bf16.mxu1 %v2026_v3 }
 0xe95   :  { %v740_v5 = vpop.f32.mrb[6].mxu1 }
 0xe96   :  { %v744_v6 = vadd.f32 %v740_v5, %v157_v2  ;;  %v1733_v7 = vpop.f32.mrb[7].mxu1 }
 0xe98   :  { %1938 = vtanh.f32 %v744_v6  ;;  %v1565_v11 = vmul.f32 -1.442695, %v744_v6 }
 0xe9a   :  { %1940 = vpow2.f32 %v1565_v11 }
 0xea2   :  { %v1939_v8 = vpop.eup %1938 }
 0xea3   :  { %754 = vrot.lane.b32.xlu0 %v1939_v8, %s2029_s29 }
 0xea4   :  { %v1941_v13 = vpop.eup %1940 }
 0xea5   :  { %v748_v16 = vadd.f32 1.0, %v1941_v13 }
 0xea7   :  { %1942 = vrcp.f32 %v748_v16 }
 0xeb1   :  { %v1943_v17 = vpop.eup %1942 }
 0xeb2   :  { %v752_v20 = vmul.f32 %v1943_v17, %v662_v58 }
 0xf15   :  { %v755_v18 = vpop.permute.xlu0 %754 }
 0xf16   :  { %v757_v19 = vmul.f32 %v1943_v17, %v755_v18 }
 0xf18   :  { %759 = vrot.lane.b32.xlu1 %v757_v19, %s2030_s3 }
 0xf8a   :  { %v760_v21 = vpop.permute.xlu1 %759 }
 0xf8b   :  { %v762_v61 = vadd.f32 %v760_v21, %v752_v20 }
 0xf8d   :  { %1944 = vtanh.f32 %v762_v61 }
 0xf97   :  { %v1945_v22 = vpop.eup %1944 }
 0xf98   :  { %765 = vrot.lane.b32.xlu0 %v1945_v22, %s2029_s29 }
0x100a   :  { %v766_v23 = vpop.permute.xlu0 %765 }
0x100b   :  { %v768_v24 = vmul.f32 %v1943_v17, %v766_v23 }
0x100d   :  { %770 = vrot.lane.b32.xlu1 %v768_v24, %s2030_s3 }
0x107f   :  { %v771_v25 = vpop.permute.xlu1 %770 }
0x1080   :  { %1743 = vmatmul.mubr.msk.f32.vlgmr.msra.gmra.mrb[12].mxu0 %vm170_vm3, %v771_v25 }
0x1081   :  { %1861 = vmatpush3.bf16.msra.mxu0 %v2068_v4  ;;  %1764 = vmatprep.mubr.msk.f32.mxu0 %vm2027_vm2, %v2028_v10 }
0x1082   :  { %1862 = vmatprep.subr.bf16.mxu0 %v2026_v3 }
0x1085   :  { %1864 = vmatpush3.bf16.msra.mxu0 %v2085_v9 }
0x1086   :  { %1871 = vmatprep.subr.bf16.mxu0 %v2026_v3 }
0x1153   :  { %v840_v27 = vpop.f32.mrb[12].mxu0 }
0x1154   :  { %v844_v28 = vadd.f32 %v840_v27, %v162_v26  ;;  %v1744_v29 = vpop.f32.mrb[13].mxu0 }
0x1156   :  { %1946 = vtanh.f32 %v844_v28  ;;  %v1567_v31 = vmul.f32 -1.442695, %v844_v28 }
0x1158   :  { %1948 = vpow2.f32 %v1567_v31 }
0x1160   :  { %v1947_v30 = vpop.eup %1946 }
0x1161   :  { %854 = vrot.lane.b32.xlu0 %v1947_v30, %s2029_s29 }
0x1162   :  { %v1949_v32 = vpop.eup %1948 }
0x1163   :  { %v848_v33 = vadd.f32 1.0, %v1949_v32 }
0x1165   :  { %1950 = vrcp.f32 %v848_v33 }
0x116f   :  { %v1951_v34 = vpop.eup %1950 }
0x1170   :  { %v852_v37 = vmul.f32 %v1951_v34, %v762_v61 }
0x11d3   :  { %v855_v35 = vpop.permute.xlu0 %854 }
0x11d4   :  { %v857_v36 = vmul.f32 %v1951_v34, %v855_v35 }
0x11d6   :  { %859 = vrot.lane.b32.xlu1 %v857_v36, %s2030_s3 }
0x1248   :  { %v860_v38 = vpop.permute.xlu1 %859 }
0x1249   :  { %v862_v0 = vadd.f32 %v860_v38, %v852_v37 }
0x124b   :  { %1952 = vtanh.f32 %v862_v0 }
0x1255   :  { %v1953_v39 = vpop.eup %1952 }
0x1256   :  { %865 = vrot.lane.b32.xlu0 %v1953_v39, %s2029_s29 }
0x12c8   :  { %v866_v40 = vpop.permute.xlu0 %865 }
0x12c9   :  { %v868_v41 = vmul.f32 %v1951_v34, %v866_v40 }
0x12cb   :  { %870 = vrot.lane.b32.xlu1 %v868_v41, %s2030_s3 }
0x133d   :  { %v871_v42 = vpop.permute.xlu1 %870 }
0x133e   :  { %1754 = vmatmul.mubr.msk.f32.vlgmr.msra.gmra.mrb[8].mxu1 %vm170_vm3, %v871_v42 }
0x133f   :  { %1867 = vmatpush3.bf16.msra.mxu1 %v2068_v4  ;;  %1775 = vmatprep.mubr.msk.f32.mxu1 %vm2027_vm2, %v2028_v10 }
0x1340   :  { %1868 = vmatprep.subr.bf16.mxu1 %v2026_v3 }
0x1343   :  { %1870 = vmatpush3.bf16.msra.mxu1 %v2085_v9 }
0x1344   :  { %1877 = vmatprep.subr.bf16.mxu1 %v2026_v3 }
0x1411   :  { %v940_v44 = vpop.f32.mrb[8].mxu1 }
0x1412   :  { %v944_v45 = vadd.f32 %v940_v44, %v2238_v43  ;;  %v1755_v46 = vpop.f32.mrb[9].mxu1 }
0x1414   :  { %1954 = vtanh.f32 %v944_v45  ;;  %v1569_v48 = vmul.f32 -1.442695, %v944_v45 }
0x1416   :  { %1956 = vpow2.f32 %v1569_v48 }
0x141e   :  { %v1955_v47 = vpop.eup %1954 }
0x141f   :  { %954 = vrot.lane.b32.xlu0 %v1955_v47, %s2029_s29 }
0x1420   :  { %v1957_v49 = vpop.eup %1956 }
0x1421   :  { %v948_v50 = vadd.f32 1.0, %v1957_v49 }
0x1423   :  { %1958 = vrcp.f32 %v948_v50 }
0x142d   :  { %v1959_v51 = vpop.eup %1958 }
0x142e   :  { %v952_v15 = vmul.f32 %v1959_v51, %v862_v0 }
0x1491   :  { %v955_v52 = vpop.permute.xlu0 %954 }
0x1492   :  { %v957_v53 = vmul.f32 %v1959_v51, %v955_v52 }
0x1494   :  { %959 = vrot.lane.b32.xlu1 %v957_v53, %s2030_s3 }
0x1506   :  { %v960_v63 = vpop.permute.xlu1 %959 }
0x1507   :  { %v962_v54 = vadd.f32 %v960_v63, %v952_v15 }
0x1509   :  { %1960 = vtanh.f32 %v962_v54 }
0x1513   :  { %v1961_v55 = vpop.eup %1960 }
0x1514   :  { %965 = vrot.lane.b32.xlu0 %v1961_v55, %s2029_s29 }
0x1586   :  { %v966_v56 = vpop.permute.xlu0 %965 }
0x1587   :  { %v968_v57 = vmul.f32 %v1959_v51, %v966_v56 }
0x1589   :  { %970 = vrot.lane.b32.xlu1 %v968_v57, %s2030_s3 }
0x15fb   :  { %v971_v58 = vpop.permute.xlu1 %970 }
0x15fc   :  { %1765 = vmatmul.mubr.msk.f32.vlgmr.msra.gmra.mrb[14].mxu0 %vm170_vm3, %v971_v58 }
0x15fd   :  { %1873 = vmatpush3.bf16.msra.mxu0 %v2068_v4  ;;  %1786 = vmatprep.mubr.msk.f32.mxu0 %vm2027_vm2, %v2028_v10 }
0x15fe   :  { %1874 = vmatprep.subr.bf16.mxu0 %v2026_v3 }
0x1601   :  { %1876 = vmatpush3.bf16.msra.mxu0 %v2085_v9 }
0x1602   :  { %1883 = vmatprep.subr.bf16.mxu0 %v2026_v3 }
0x16cf   :  { %v1040_v59 = vpop.f32.mrb[14].mxu0 }
0x16d0   :  { %v1044_v60 = vadd.f32 %v1040_v59, %v2238_v43  ;;  %v1766_v62 = vpop.f32.mrb[15].mxu0 }
0x16d2   :  { %1962 = vtanh.f32 %v1044_v60  ;;  %v1571_v2 = vmul.f32 -1.442695, %v1044_v60 }
0x16d4   :  { %1964 = vpow2.f32 %v1571_v2 }
0x16dc   :  { %v1963_v1 = vpop.eup %1962 }
0x16dd   :  { %1054 = vrot.lane.b32.xlu0 %v1963_v1, %s2029_s29 }
0x16de   :  { %v1965_v5 = vpop.eup %1964 }
0x16df   :  { %v1048_v6 = vadd.f32 1.0, %v1965_v5 }
0x16e1   :  { %1966 = vrcp.f32 %v1048_v6 }
0x16eb   :  { %v1967_v7 = vpop.eup %1966 }
0x16ec   :  { %v1052_v13 = vmul.f32 %v1967_v7, %v962_v54 }
0x174f   :  { %v1055_v8 = vpop.permute.xlu0 %1054 }
0x1750   :  { %v1057_v11 = vmul.f32 %v1967_v7, %v1055_v8 }
0x1752   :  { %1059 = vrot.lane.b32.xlu1 %v1057_v11, %s2030_s3 }
0x17c4   :  { %v1060_v16 = vpop.permute.xlu1 %1059 }
0x17c5   :  { %v1062_v17 = vadd.f32 %v1060_v16, %v1052_v13  ;;  %v1071_v13 = vsub.s32 1, %v2104_v12 }
0x17c7   :  { %1968 = vtanh.f32 %v1062_v17 }
0x17d1   :  { %v1969_v18 = vpop.eup %1968 }
0x17d2   :  { %1065 = vrot.lane.b32.xlu0 %v1969_v18, %s2029_s29 }
0x1844   :  { %v1066_v19 = vpop.permute.xlu0 %1065 }
0x1845   :  { %v2256_v20 = vmul.f32 %v1967_v7, %v1066_v19 }
0x1847   :  { %1086 = vrot.lane.b32.xlu1 %v2256_v20, %s2030_s3 }
0x18b9   :  { %v1087_v21 = vpop.permute.xlu1 %1086 }
0x18ba   :  { %1776 = vmatmul.mubr.msk.f32.vlgmr.msra.gmra.mrb[10].mxu1 %vm170_vm3, %v1087_v21 }
0x18bb   :  { %1879 = vmatpush3.bf16.msra.mxu1 %v2068_v4  ;;  %1797 = vmatprep.mubr.msk.f32.mxu1 %vm2027_vm2, %v2028_v10 }
0x18bc   :  { %1880 = vmatprep.subr.bf16.mxu1 %v2026_v3 }
0x18bf   :  { %1882 = vmatpush3.bf16.msra.mxu1 %v2085_v9 }
0x198d   :  { %v1156_v61 = vpop.f32.mrb[10].mxu1 }
0x198e   :  { %v1160_v22 = vadd.f32 %v1156_v61, %v2238_v43  ;;  %v1777_v23 = vpop.f32.mrb[11].mxu1 }
0x1990   :  { %1970 = vtanh.f32 %v1160_v22  ;;  %v1573_v25 = vmul.f32 -1.442695, %v1160_v22 }
0x1992   :  { %1972 = vpow2.f32 %v1573_v25 }
0x199a   :  { %v1971_v24 = vpop.eup %1970 }
0x199b   :  { %1170 = vrot.lane.b32.xlu0 %v1971_v24, %s2029_s29 }
0x199c   :  { %v1973_v26 = vpop.eup %1972 }
0x199d   :  { %v1164_v27 = vadd.f32 1.0, %v1973_v26 }
0x199f   :  { %1974 = vrcp.f32 %v1164_v27 }
0x19a9   :  { %v1975_v28 = vpop.eup %1974 }
0x19aa   :  { %v1168_v31 = vmul.f32 %v1975_v28, %v1062_v17  ;;  %v1072_v17 = vrot.slane %v2110_v14, %v1071_v13 }
0x1a0d   :  { %v1171_v29 = vpop.permute.xlu0 %1170 }
0x1a0e   :  { %v1173_v30 = vmul.f32 %v1975_v28, %v1171_v29 }
0x1a10   :  { %1175 = vrot.lane.b32.xlu1 %v1173_v30, %s2030_s3 }
0x1a82   :  { %v1176_v32 = vpop.permute.xlu1 %1175 }
0x1a83   :  { %v1178_v33 = vadd.f32 %v1176_v32, %v1168_v31 }
0x1a85   :  { %1976 = vtanh.f32 %v1178_v33 }
0x1a8f   :  { %v1977_v34 = vpop.eup %1976 }
0x1a90   :  { %1181 = vrot.lane.b32.xlu0 %v1977_v34, %s2029_s29 }
0x1b02   :  { %v1182_v35 = vpop.permute.xlu0 %1181 }
0x1b03   :  { %v2270_v36 = vmul.f32 %v1975_v28, %v1182_v35 }
0x1b05   :  { %1194 = vrot.lane.b32.xlu1 %v2270_v36, %s2030_s3 }
0x1b77   :  { %v1195_v37 = vpop.permute.xlu1 %1194 }
0x1b78   :  { %1787 = vmatmul.mubr.msk.f32.vlgmr.msra.gmra.mrb[16].mxu0 %vm170_vm3, %v1195_v37 }
0x1b79   :  { %1885 = vmatpush3.bf16.msra.mxu0 %v2068_v4  ;;  %1808 = vmatprep.mubr.msk.f32.mxu0 %vm2027_vm2, %v2028_v10 }
0x1b7a   :  { %1886 = vmatprep.subr.bf16.mxu0 %v2026_v3 }
0x1b7d   :  { %1888 = vmatpush3.bf16.msra.mxu0 %v2085_v9 }
0x1c4b   :  { %v1264_v38 = vpop.f32.mrb[16].mxu0 }
0x1c4c   :  { %v1268_v0 = vadd.f32 %v1264_v38, %v2238_v43  ;;  %v1788_v39 = vpop.f32.mrb[17].mxu0 }
0x1c4e   :  { %1978 = vtanh.f32 %v1268_v0  ;;  %v1575_v41 = vmul.f32 -1.442695, %v1268_v0 }
0x1c50   :  { %1980 = vpow2.f32 %v1575_v41 }
0x1c58   :  { %v1979_v40 = vpop.eup %1978 }
0x1c59   :  { %1278 = vrot.lane.b32.xlu0 %v1979_v40, %s2029_s29  ;;  %v1525_v40 = vrot.slane %v2110_v14, 2 }
0x1c5a   :  { %v1981_v42 = vpop.eup %1980 }
0x1c5b   :  { %v1272_v44 = vadd.f32 1.0, %v1981_v42  ;;  %1889 = vpush %v1525_v40 }
0x1c5d   :  { %1982 = vrcp.f32 %v1272_v44 }
0x1c67   :  { %v1983_v4 = vpop.eup %1982 }
0x1c68   :  { %v1276_v3 = vmul.f32 %v1983_v4, %v1178_v33 }
0x1c8c   :  { %s1890_s16 = spop %1889 }
0x1ccb   :  { %v1279_v45 = vpop.permute.xlu0 %1278 }
0x1ccc   :  { %v1281_v10 = vmul.f32 %v1983_v4, %v1279_v45 }
0x1cce   :  { %1283 = vrot.lane.b32.xlu1 %v1281_v10, %s2030_s3 }
0x1d40   :  { %v1284_v9 = vpop.permute.xlu1 %1283 }
0x1d41   :  { %v1286_v46 = vadd.f32 %v1284_v9, %v1276_v3 }
0x1d43   :  { %1984 = vtanh.f32 %v1286_v46 }
0x1d4d   :  { %v1985_v47 = vpop.eup %1984 }
0x1d4e   :  { %1289 = vrot.lane.b32.xlu0 %v1985_v47, %s2029_s29 }
0x1dc0   :  { %v1290_v48 = vpop.permute.xlu0 %1289 }
0x1dc1   :  { %v1292_v49 = vmul.f32 %v1983_v4, %v1290_v48 }
0x1dc3   :  { %1302 = vrot.lane.b32.xlu1 %v1292_v49, %s2030_s3 }
0x1e35   :  { %v1303_v50 = vpop.permute.xlu1 %1302 }
0x1e36   :  { %1798 = vmatmul.mubr.msk.f32.vlgmr.msra.gmra.mrb[12].mxu1 %vm170_vm3, %v1303_v50 }
0x1f09   :  { %v1372_v51 = vpop.f32.mrb[12].mxu1 }
0x1f0a   :  { %v1376_v52 = vadd.f32 %v1372_v51, %v2238_v43  ;;  %v1799_v53 = vpop.f32.mrb[13].mxu1 }
0x1f0c   :  { %1986 = vtanh.f32 %v1376_v52  ;;  %v1577_v63 = vmul.f32 -1.442695, %v1376_v52 }
0x1f0e   :  { %1988 = vpow2.f32 %v1577_v63 }
0x1f16   :  { %v1987_v15 = vpop.eup %1986 }
0x1f17   :  { %1386 = vrot.lane.b32.xlu0 %v1987_v15, %s2029_s29 }
0x1f18   :  { %v1989_v54 = vpop.eup %1988 }
0x1f19   :  { %v1380_v55 = vadd.f32 1.0, %v1989_v54 }
0x1f1b   :  { %1990 = vrcp.f32 %v1380_v55 }
0x1f25   :  { %v1991_v56 = vpop.eup %1990 }
0x1f26   :  { %v1384_v59 = vmul.f32 %v1991_v56, %v1286_v46  ;;  %v1527_v46 = vstv %s1890_s16 }
0x1f89   :  { %v1387_v57 = vpop.permute.xlu0 %1386 }
0x1f8a   :  { %v1389_v58 = vmul.f32 %v1991_v56, %v1387_v57 }
0x1f8c   :  { %1391 = vrot.lane.b32.xlu1 %v1389_v58, %s2030_s3 }
0x1ffe   :  { %v1392_v60 = vpop.permute.xlu1 %1391 }
0x1fff   :  { %v1394_v62 = vadd.f32 %v1392_v60, %v1384_v59 }
0x2001   :  { %1992 = vtanh.f32 %v1394_v62 }
0x200b   :  { %v1993_v1 = vpop.eup %1992 }
0x200c   :  { %1397 = vrot.lane.b32.xlu0 %v1993_v1, %s2029_s29 }
0x207e   :  { %v1398_v2 = vpop.permute.xlu0 %1397 }
0x207f   :  { %v1400_v5 = vmul.f32 %v1991_v56, %v1398_v2 }
0x2081   :  { %1410 = vrot.lane.b32.xlu1 %v1400_v5, %s2030_s3 }
0x20f3   :  { %v1411_v6 = vpop.permute.xlu1 %1410 }
0x20f4   :  { %1809 = vmatmul.mubr.msk.f32.vlgmr.msra.gmra.mrb[18].mxu0 %vm170_vm3, %v1411_v6 }
0x21c7   :  { %v1480_v7 = vpop.f32.mrb[18].mxu0 }
0x21c8   :  { %v1484_v8 = vadd.f32 %v1480_v7, %v2238_v43  ;;  %v1810_v11 = vpop.f32.mrb[19].mxu0 }
0x21ca   :  { %1994 = vtanh.f32 %v1484_v8  ;;  %v1579_v18 = vmul.f32 -1.442695, %v1484_v8 }
0x21cc   :  { %1996 = vpow2.f32 %v1579_v18 }
0x21d4   :  { %v1995_v16 = vpop.eup %1994 }
0x21d5   :  { %1494 = vrot.lane.b32.xlu0 %v1995_v16, %s2029_s29 }
0x21d6   :  { %v1997_v19 = vpop.eup %1996 }
0x21d7   :  { %v1488_v21 = vadd.f32 1.0, %v1997_v19 }
0x21d9   :  { %1074 = vrot.lane.b32.xlu0 %v1072_v17, %s2031_s0  ;;  %1998 = vrcp.f32 %v1488_v21 }
0x21e3   :  { %v1999_v61 = vpop.eup %1998 }
0x21e4   :  { %v1492_v25 = vmul.f32 %v1999_v61, %v1394_v62 }
0x2247   :  { %v1495_v22 = vpop.permute.xlu0 %1494 }
0x2248   :  { %v1497_v23 = vmul.f32 %v1999_v61, %v1495_v22 }
0x224a   :  { %1499 = vrot.lane.b32.xlu1 %v1497_v23, %s2030_s3 }
0x224b   :  { %v1075_v43 = vpop.permute.xlu0 %1074 }
0x224c   :  { %v1077_v12 = vmul.f32 %v1075_v43, %v2256_v20  ;;  %v1293_v24 = vmul.f32 %v1292_v49, %v1075_v43  ;;  %v1185_v29 = vmul.f32 %v2270_v36, %v1075_v43  ;;  %v1401_v30 = vmul.f32 %v1400_v5, %v1075_v43 }
0x224e   :  { %1079 = vrot.lane.b32.xlu0 %v1077_v12, %s2030_s3 }
0x2252   :  { %1295 = vrot.lane.b32.xlu0 %v1293_v24, %s2030_s3 }
0x22bc   :  { %v1500_v26 = vpop.permute.xlu1 %1499 }
0x22bd   :  { %v1502_v27 = vadd.f32 %v1500_v26, %v1492_v25 }
0x22bf   :  { %2000 = vtanh.f32 %v1502_v27 }
0x22c0   :  { %v1080_v20 = vpop.permute.xlu0 %1079 }
0x22c1   :  { %v1082_v31 = vsel %vm170_vm3, %v1080_v20, 0.0 }
0x22c4   :  { %v1296_v0 = vpop.permute.xlu0 %1295 }
0x22c5   :  { %v1298_v39 = vsel %vm170_vm3, %v1296_v0, 0.0 }
0x22c9   :  { %v2001_v28 = vpop.eup %2000 }
0x22ca   :  { %1505 = vrot.lane.b32.xlu1 %v2001_v28, %s2029_s29 }
0x22ce   :  { %1187 = vrot.lane.b32.xlu1 %v1185_v29, %s2030_s3 }
0x22d2   :  { %1403 = vrot.lane.b32.xlu1 %v1401_v30, %s2030_s3 }
0x22f6   :  { %1083 = vadd.xlane.f32.xlu1 %v1082_v31 }
0x233c   :  { %v1506_v32 = vpop.permute.xlu1 %1505 }
0x233d   :  { %v1508_v33 = vmul.f32 %v1999_v61, %v1506_v32 }
0x233f   :  { %v1509_v34 = vmul.f32 %v1508_v33, %v1075_v43 }
0x2340   :  { %v1188_v35 = vpop.permute.xlu1 %1187 }
0x2341   :  { %1511 = vrot.lane.b32.xlu0 %v1509_v34, %s2030_s3  ;;  %v1190_v36 = vsel %vm170_vm3, %v1188_v35, 0.0 }
0x2344   :  { %v1404_v37 = vpop.permute.xlu1 %1403 }
0x2345   :  { %v1406_v38 = vsel %vm170_vm3, %v1404_v37, 0.0 }
0x2346   :  { %1407 = vadd.xlane.f32.xlu1 %v1406_v38 }
0x2360   :  { %1191 = vadd.xlane.f32.xlu0 %v1190_v36 }
0x2364   :  { %1299 = vadd.xlane.f32.xlu0 %v1298_v39 }
0x2383   :  { %v1084_v45 = vpop.xlane.xlu1 %1083 }
0x23b3   :  { %v1512_v41 = vpop.permute.xlu0 %1511 }
0x23b4   :  { %v1514_v42 = vsel %vm170_vm3, %v1512_v41, 0.0 }
0x23b5   :  { %1515 = vadd.xlane.f32.xlu0 %v1514_v42 }
0x23d3   :  { %v1408_v9 = vpop.xlane.xlu1 %1407 }
0x23ed   :  { %v1192_v44 = vpop.xlane.xlu0 %1191 }
0x23ee   :  { %v1518_v10 = vsel %vm1517_vm4, %v1084_v45, %v1192_v44 }
0x23f1   :  { %v1300_v4 = vpop.xlane.xlu0 %1299 }
0x23f2   :  { %v1520_v3 = vsel %vm1519_vm5, %v1518_v10, %v1300_v4 }
0x23f3   :  { %v1522_v14 = vsel %vm1521_vm6, %v1520_v3, %v1408_v9 }
0x2442   :  { %v1516_v47 = vpop.xlane.xlu0 %1515 }
0x2443   :  { %v1523_v48 = vsel %vm36_vm1, %v1522_v14, %v1516_v47 }
0x2444   :  { %v1529_v49 = vadd.f32 %v1527_v46, %v1523_v48 }
0x2446   :  { %1531 = vst.msk [vmem:[#allocation2] sm:$0xff] %vm1530_vm7, %v1529_v49 }
0x2447   :  { %2013 = shalt.err (!%p2010_p4)
}
0x2448   :  { %s2014_s22 = scalar_lea.hbm %s2328_s4, 128 }
0x2449   :  { %p2015_p5 = scmp.ne.s32.totalorder %s2328_s4, %s2014_s22  ;;  %p2018_p6 = scmp.lt.u32.totalorder %s2014_s22, %s2328_s4 }
0x244b   :  { %p2020_p7 = pnand %p2018_p6, %p2015_p5 }
0x244d   :  { %2023 = shalt.err (!%p2020_p7)
}
0x244e   :  { %1541 = dma.vmem_to_hbm [thread:$0]  %s1539_s18, 128, %s2328_s4, [#allocation3]  }
0x244f   :  { %2024 = dma.done.wait [#allocation3], 128  }
0x2450   :  { %2025 = vsyncadd [#allocation3], 4294967168 }
0x2451   :  { %1545 = vsyncpa [#allocation3], 1 }

</bundles_post_ra>
